<compile_context>
chip_gen: v6e
topology: v6e:2x2x1
jax: 0.10.0
libtpu: 0.0.40
codegen_flags: <defaults>
</compile_context>

<pallas_src>
import jax
import jax.numpy as jnp
from jax.experimental import pallas as pl
from jax.experimental.pallas import tpu as pltpu


def _encoder_kernel(x_ref, act_ref, w1x_ref, w1a_ref, b1_ref, w2_ref, b2_ref, o_ref):
    # fc1 split across the concat boundary:
    #   concat([x, a], 1) @ W1 == x @ W1[:obs_dim] + a @ W1[obs_dim:]
    z1 = jnp.dot(x_ref[...], w1x_ref[...], preferred_element_type=jnp.float32)
    z1 = z1 + jnp.dot(act_ref[...], w1a_ref[...], preferred_element_type=jnp.float32)
    z1 = z1 + b1_ref[...]                      # (tB,Fp) + (1,Fp) broadcast
    h1 = jnp.maximum(z1, 0.0)
    # fc2 + ReLU (f32 accumulation on MXU, elementwise epilogue in f32)
    z2 = jnp.dot(h1.astype(w2_ref.dtype), w2_ref[...],
                 preferred_element_type=jnp.float32)
    z2 = z2 + b2_ref[...]
    o_ref[...] = jnp.maximum(z2, 0.0).astype(o_ref.dtype)


def _round_up(n, m):
    return ((n + m - 1) // m) * m


def custom_encoder_with_action(x, action, w1, b1, w2, b2, *, block_b=512):
    """
    x: (B, obs_dim), action: (B, action_size)
    w1: (obs_dim + action_size, F)   (== PyTorch fc1.weight.T)
    b1: (F,)
    w2: (F, F)                       (== PyTorch fc2.weight.T)
    b2: (F,)
    returns relu(relu([x|action] @ w1 + b1) @ w2 + b2) with shape (B, F).
    """
    B, obs_dim = x.shape
    act_dim = action.shape[1]
    F = w1.shape[1]

    # ---- parameter prep (would be done once at init in a real model) ----
    # TODO(synk): hoist the padding/splitting below out of the per-call path
    # (it is per-call here only to keep the script self-contained).
    Fp = _round_up(F, 128)
    w1p = jnp.zeros((obs_dim + act_dim, Fp), w1.dtype).at[:, :F].set(w1)
    b1p = jnp.zeros((1, Fp), jnp.float32).at[0, :F].set(b1.astype(jnp.float32))
    w2p = jnp.zeros((Fp, Fp), w2.dtype).at[:F, :F].set(w2)
    b2p = jnp.zeros((1, Fp), jnp.float32).at[0, :F].set(b2.astype(jnp.float32))
    # Split fc1 weights at the concat boundary so the wrapper never has to
    # materialize concat([x, action]) in HBM.
    w1x = w1p[:obs_dim]
    w1a = w1p[obs_dim:]

    # ---- batch tiling ----
    # Stream only activations/output; weights & biases have constant index maps
    # and stay resident in VMEM across grid steps.
    tB = min(block_b, _round_up(B, 8))
    Bp = _round_up(B, tB)
    if Bp != B:
        x = jnp.zeros((Bp, obs_dim), x.dtype).at[:B].set(x)
        action = jnp.zeros((Bp, act_dim), action.dtype).at[:B].set(action)
    grid = (Bp // tB,)

    out = pl.pallas_call(
        _encoder_kernel,
        out_shape=jax.ShapeDtypeStruct((Bp, Fp), jnp.float32),
        grid=grid,
        in_specs=[
            pl.BlockSpec((tB, obs_dim), lambda i: (i, 0)),    # x tile (streams)
            pl.BlockSpec((tB, act_dim), lambda i: (i, 0)),    # action tile (streams)
            pl.BlockSpec((obs_dim, Fp), lambda i: (0, 0)),    # W1[:obs]   (resident)
            pl.BlockSpec((act_dim, Fp), lambda i: (0, 0)),    # W1[obs:]   (resident)
            pl.BlockSpec((1, Fp), lambda i: (0, 0)),          # b1         (resident)
            pl.BlockSpec((Fp, Fp), lambda i: (0, 0)),         # W2         (resident)
            pl.BlockSpec((1, Fp), lambda i: (0, 0)),          # b2         (resident)
        ],
        out_specs=pl.BlockSpec((tB, Fp), lambda i: (i, 0)),
        compiler_params=pltpu.CompilerParams(
            # Batch axis is embarrassingly parallel: megacore shard on v7x,
            # no-op on single-TC v5e/v6e.
            dimension_semantics=("parallel",),
        ),
    )(x, action, w1x, w1a, b1p, w2p, b2p)

    # Strip batch / feature padding.
    return out[:B, :F]


def _reference(x, action, w1, b1, w2, b2):
    h = jnp.concatenate([x, action], axis=1)
    h = jnp.maximum(h @ w1 + b1, 0.0)
    h = jnp.maximum(h @ w2 + b2, 0.0)
    return h


if __name__ == "__main__":
    # Module config (observation_shape=(16,), action_size=4, feature_size=32)
    obs_dim = 16
    action_size = 4
    feature_size = 32
    batch = 8

    key = jax.random.PRNGKey(0)
    k_x, k_a, k_w1, k_b1, k_w2, k_b2 = jax.random.split(key, 6)

    x = jax.random.normal(k_x, (batch, obs_dim), dtype=jnp.float32)
    action = jax.random.normal(k_a, (batch, action_size), dtype=jnp.float32)

    # Deterministic parameter init (synthetic; not loaded from checkpoint).
    # Stored as (in_features, out_features) == PyTorch weight.T
    in1 = obs_dim + action_size
    w1 = jax.random.normal(k_w1, (in1, feature_size), dtype=jnp.float32) * 0.1
    b1 = jax.random.normal(k_b1, (feature_size,), dtype=jnp.float32) * 0.1
    w2 = jax.random.normal(k_w2, (feature_size, feature_size), dtype=jnp.float32) * 0.1
    b2 = jax.random.normal(k_b2, (feature_size,), dtype=jnp.float32) * 0.1

    out = custom_encoder_with_action(x, action, w1, b1, w2, b2)
    out = jax.block_until_ready(out)

    ref = _reference(x, action, w1, b1, w2, b2)
    assert out.shape == (batch, feature_size)
    assert jnp.allclose(out, ref, atol=1e-5, rtol=1e-5), "mismatch vs reference"

    print("KERNEL_OK")
</pallas_src>

<mosaic_0001>
module attributes {stable_mosaic.version = 11 : i64} {
  func.func @_encoder_kernel(%arg0: i32, %arg1: memref<8x16xf32, #tpu.memory_space<vmem>>, %arg2: memref<8x4xf32, #tpu.memory_space<vmem>>, %arg3: memref<16x128xf32, #tpu.memory_space<vmem>>, %arg4: memref<4x128xf32, #tpu.memory_space<vmem>>, %arg5: memref<1x128xf32, #tpu.memory_space<vmem>>, %arg6: memref<128x128xf32, #tpu.memory_space<vmem>>, %arg7: memref<1x128xf32, #tpu.memory_space<vmem>>, %arg8: memref<8x128xf32, #tpu.memory_space<vmem>>) attributes {dimension_semantics = [#tpu.dimension_semantics<parallel>], iteration_bounds = array<i64: 1>, scalar_prefetch = 0 : i64, scratch_operands = 0 : i64, tpu.core_type = #tpu.core_type<tc>, window_params = [{transform_indices = @transform_0, window_bounds = array<i64: 8, 16>}, {transform_indices = @transform_1, window_bounds = array<i64: 8, 4>}, {pipeline_mode = #tpu.pipeline_mode<synchronous>, transform_indices = @transform_2, window_bounds = array<i64: 16, 128>}, {pipeline_mode = #tpu.pipeline_mode<synchronous>, transform_indices = @transform_3, window_bounds = array<i64: 4, 128>}, {pipeline_mode = #tpu.pipeline_mode<synchronous>, transform_indices = @transform_4, window_bounds = array<i64: 1, 128>}, {pipeline_mode = #tpu.pipeline_mode<synchronous>, transform_indices = @transform_5, window_bounds = array<i64: 128, 128>}, {pipeline_mode = #tpu.pipeline_mode<synchronous>, transform_indices = @transform_6, window_bounds = array<i64: 1, 128>}, {transform_indices = @transform_7, window_bounds = array<i64: 8, 128>}]} {
    %c0 = arith.constant 0 : index
    %c0_0 = arith.constant 0 : index
    %0 = vector.load %arg1[%c0, %c0_0] : memref<8x16xf32, #tpu.memory_space<vmem>>, vector<8x16xf32>
    %c0_1 = arith.constant 0 : index
    %c0_2 = arith.constant 0 : index
    %1 = vector.load %arg3[%c0_1, %c0_2] : memref<16x128xf32, #tpu.memory_space<vmem>>, vector<16x128xf32>
    %cst = arith.constant dense<0.000000e+00> : vector<8x128xf32>
    %2 = tpu.matmul %0, %1, %cst {dimension_numbers = #tpu.dot_dimension_numbers<[1], [0], [0], [1], [0, 0, 1, 1], [], []>} : vector<8x16xf32>, vector<16x128xf32>, vector<8x128xf32> -> vector<8x128xf32>
    %c0_3 = arith.constant 0 : index
    %c0_4 = arith.constant 0 : index
    %3 = vector.load %arg2[%c0_3, %c0_4] : memref<8x4xf32, #tpu.memory_space<vmem>>, vector<8x4xf32>
    %c0_5 = arith.constant 0 : index
    %c0_6 = arith.constant 0 : index
    %4 = vector.load %arg4[%c0_5, %c0_6] : memref<4x128xf32, #tpu.memory_space<vmem>>, vector<4x128xf32>
    %cst_7 = arith.constant dense<0.000000e+00> : vector<8x128xf32>
    %5 = tpu.matmul %3, %4, %cst_7 {dimension_numbers = #tpu.dot_dimension_numbers<[1], [0], [0], [1], [0, 0, 1, 1], [], []>} : vector<8x4xf32>, vector<4x128xf32>, vector<8x128xf32> -> vector<8x128xf32>
    %6 = arith.addf %2, %5 : vector<8x128xf32>
    %c0_8 = arith.constant 0 : index
    %c0_9 = arith.constant 0 : index
    %7 = vector.load %arg5[%c0_8, %c0_9] : memref<1x128xf32, #tpu.memory_space<vmem>>, vector<1x128xf32>
    %8 = vector.broadcast %7 : vector<1x128xf32> to vector<8x128xf32>
    %9 = arith.addf %6, %8 : vector<8x128xf32>
    %cst_10 = arith.constant 0.000000e+00 : f32
    %10 = vector.broadcast %cst_10 : f32 to vector<8x128xf32>
    %11 = arith.maximumf %9, %10 : vector<8x128xf32>
    %c0_11 = arith.constant 0 : index
    %c0_12 = arith.constant 0 : index
    %12 = vector.load %arg6[%c0_11, %c0_12] : memref<128x128xf32, #tpu.memory_space<vmem>>, vector<128x128xf32>
    %cst_13 = arith.constant dense<0.000000e+00> : vector<8x128xf32>
    %13 = tpu.matmul %11, %12, %cst_13 {dimension_numbers = #tpu.dot_dimension_numbers<[1], [0], [0], [1], [0, 0, 1, 1], [], []>} : vector<8x128xf32>, vector<128x128xf32>, vector<8x128xf32> -> vector<8x128xf32>
    %c0_14 = arith.constant 0 : index
    %c0_15 = arith.constant 0 : index
    %14 = vector.load %arg7[%c0_14, %c0_15] : memref<1x128xf32, #tpu.memory_space<vmem>>, vector<1x128xf32>
    %15 = vector.broadcast %14 : vector<1x128xf32> to vector<8x128xf32>
    %16 = arith.addf %13, %15 : vector<8x128xf32>
    %cst_16 = arith.constant 0.000000e+00 : f32
    %17 = vector.broadcast %cst_16 : f32 to vector<8x128xf32>
    %18 = arith.maximumf %16, %17 : vector<8x128xf32>
    %c0_17 = arith.constant 0 : index
    %c0_18 = arith.constant 0 : index
    %19 = vector.load %arg8[%c0_17, %c0_18] : memref<8x128xf32, #tpu.memory_space<vmem>>, vector<8x128xf32>
    tpu.vector_store %arg8[%c0_17, %c0_18], %18 {strides = array<i32>} : memref<8x128xf32, #tpu.memory_space<vmem>>, vector<8x128xf32>,
    return
  }
  func.func @transform_0(%arg0: i32) -> (i32, i32) {
    %c0_i32 = arith.constant 0 : i32
    %c0_i32_0 = arith.constant 0 : i32
    return %arg0, %c0_i32 : i32, i32
  }
  func.func @transform_1(%arg0: i32) -> (i32, i32) {
    %c0_i32 = arith.constant 0 : i32
    %c0_i32_0 = arith.constant 0 : i32
    return %arg0, %c0_i32 : i32, i32
  }
  func.func @transform_2(%arg0: i32) -> (i32, i32) {
    %c0_i32 = arith.constant 0 : i32
    %c0_i32_0 = arith.constant 0 : i32
    %c0_i32_1 = arith.constant 0 : i32
    return %c0_i32, %c0_i32_0 : i32, i32
  }
  func.func @transform_3(%arg0: i32) -> (i32, i32) {
    %c0_i32 = arith.constant 0 : i32
    %c0_i32_0 = arith.constant 0 : i32
    %c0_i32_1 = arith.constant 0 : i32
    return %c0_i32, %c0_i32_0 : i32, i32
  }
  func.func @transform_4(%arg0: i32) -> (i32, i32) {
    %c0_i32 = arith.constant 0 : i32
    %c0_i32_0 = arith.constant 0 : i32
    %c0_i32_1 = arith.constant 0 : i32
    return %c0_i32, %c0_i32_0 : i32, i32
  }
  func.func @transform_5(%arg0: i32) -> (i32, i32) {
    %c0_i32 = arith.constant 0 : i32
    %c0_i32_0 = arith.constant 0 : i32
    %c0_i32_1 = arith.constant 0 : i32
    return %c0_i32, %c0_i32_0 : i32, i32
  }
  func.func @transform_6(%arg0: i32) -> (i32, i32) {
    %c0_i32 = arith.constant 0 : i32
    %c0_i32_0 = arith.constant 0 : i32
    %c0_i32_1 = arith.constant 0 : i32
    return %c0_i32, %c0_i32_0 : i32, i32
  }
  func.func @transform_7(%arg0: i32) -> (i32, i32) {
    %c0_i32 = arith.constant 0 : i32
    %c0_i32_0 = arith.constant 0 : i32
    return %arg0, %c0_i32 : i32, i32
  }
}

</mosaic_0001>

<bundles_post_ra>
// kernel: tpu_custom_call.1
= control target key start
LH: loop header
LB: loop body
LE: loop exit
PB: predicated region body
PF: predicated region fallthrough
CT: control target
= control target key end

     0   :  { %12 = vsyncpa [#allocation3], 0  ;;  %s572_s0 = inlined_call_operand.vmem [shape: f32[8,16], index: 0, kind: input, shape index: {}]   ;;  %s573_s1 = inlined_call_operand.vmem [shape: f32[8,4], index: 1, kind: input, shape index: {}]   ;;  %s574_s2 = inlined_call_operand.hbm [shape: f32[16,128], index: 2, kind: input, shape index: {}]   ;;  %s575_s3 = inlined_call_operand.vmem [shape: f32[4,128], index: 3, kind: input, shape index: {}]   ;;  %s576_s4 = inlined_call_operand.vmem [shape: f32[1,128], index: 4, kind: input, shape index: {}]   ;;  %s577_s5 = inlined_call_operand.hbm [shape: f32[128,128], index: 5, kind: input, shape index: {}]   ;;  %s578_s6 = inlined_call_operand.vmem [shape: f32[1,128], index: 6, kind: input, shape index: {}]   ;;  %s579_s7 = inlined_call_operand.hbm [shape: f32[8,128], index: 7, kind: output, shape index: {}]  }
   0x1   :  { %13 = vsyncpa [#allocation6], 0 }
   0x2   :  { %14 = vsyncpa [#allocation4], 0  ;;  %s479_s24 = smov [#allocation2]  }
   0x3   :  { %s24_s25 = sshll.u32 %s479_s24, 4  ;;  %s25_s25 = int_to_ptr.vmem [resolvable:$true] %s24_s25 }
   0x4   :  { %s421_s26 = scalar_lea.vmem %s25_s25, 256  ;;  %p426_p1 = scmp.lt.s32.totalorder %s25_s25, %s25_s25 }
   0x5   :  { %p422_p0 = scmp.ne.s32.totalorder %s25_s25, %s421_s26  ;;  %p427_p2 = scmp.lt.s32.totalorder %s421_s26, %s421_s26 }
   0x7   :  { %p428_p3 = por %p427_p2, %p426_p1 }
   0x9   :  { %p429_p4 = pnand %p428_p3, %p422_p0 }
   0xb   :  { %432 = shalt.err (!%p429_p4)
}
   0xc   :  { %s480_s27 = smov 128   ;;  %s481_s28 = smov 8  }
   0xd   :  { %30 = dma.hbm_to_vmem [thread:$0]  %s574_s2, 256, %s25_s25, [#allocation3], %s480_s27, %s480_s27, %s481_s28  }
   0xe   :  { %s482_s8 = smov [#allocation5]  }
   0xf   :  { %s40_s9 = sshll.u32 %s482_s8, 4  ;;  %s41_s9 = int_to_ptr.vmem [resolvable:$true] %s40_s9 }
  0x10   :  { %s441_s10 = scalar_lea.vmem %s41_s9, 2048  ;;  %p446_p6 = scmp.lt.s32.totalorder %s41_s9, %s41_s9 }
  0x11   :  { %p442_p5 = scmp.ne.s32.totalorder %s41_s9, %s441_s10  ;;  %p447_p7 = scmp.lt.s32.totalorder %s441_s10, %s441_s10 }
  0x13   :  { %p448_p8 = por %p447_p7, %p446_p6 }
  0x15   :  { %p449_p9 = pnand %p448_p8, %p442_p5 }
  0x17   :  { %452 = shalt.err (!%p449_p9)
}
  0x18   :  { %46 = dma.hbm_to_vmem [thread:$0]  %s577_s5, 2048, %s41_s9, [#allocation6], %s480_s27, %s480_s27, %s481_s28  }
  0x19   :  { %473 = dma.done.wait [#allocation3], 256  }
  0x1a   :  { %474 = vsyncadd [#allocation3], 4294967040 }
  0x1b   :  { %475 = dma.done.wait [#allocation6], 2048  }
  0x1c   :  { %476 = vsyncadd [#allocation6], 4294965248  ;;  %v483_v0 = vmov 0.0   ;;  %vm484_vm0 = vmmov 0   ;;  %vm64_vm1 = vcmask 1043456   ;;  %vm60_vm2 = vcmask 31744  }
  0x1d   :  { %359 = vmatprep.subr.mxu1 %v483_v0  ;;  %361 = vmatprep.mubr.msk.f32.mxu1 %vm484_vm0, %v483_v0  ;;  %v59_v1 = vld [vmem:[%s575_s3] sm:$0xf]  ;;  %v57_v3 = vld [vmem:[#allocation2 + $0x8] sm:$0xff]  ;;  %vm138_vm3 = vcmask 130048   ;;  %v234_v8 = vld [vmem:[#allocation5 + $0x68] sm:$0xff]  ;;  %s485_s18 = smov [#allocation7]  }
  0x1e   :  { %371 = vmatprep.subr.mxu0 %v483_v0  ;;  %403 = vmatprep.mubr.msk.f32.mxu0 %vm484_vm0, %v483_v0  ;;  %v58_v2 = vld [vmem:[%s573_s1] sm:$0xff]  ;;  %v236_v4 = vld [vmem:[#allocation5 + $0x78] sm:$0xff]  ;;  %v233_v9 = vld [vmem:[#allocation5 + $0x60] sm:$0xff]  ;;  %s322_s19 = sshll.u32 %s485_s18, 4  ;;  %s323_s19 = int_to_ptr.vmem [resolvable:$true] %s322_s19 }
  0x1f   :  { %360 = vmatpush3.msk.msra.mxu1 %vm64_vm1, %v59_v1  ;;  %v56_v5 = vld [vmem:[#allocation2] sm:$0xff]  ;;  %372 = vmatpush3.msra.mxu0 %v236_v4  ;;  %v232_v10 = vld [vmem:[#allocation5 + $0x58] sm:$0xff]  ;;  %v230_v12 = vld [vmem:[#allocation5 + $0x48] sm:$0xff]  ;;  %s453_s20 = scalar_lea.vmem %s323_s19, 128  ;;  %p458_p11 = scmp.lt.s32.totalorder %s323_s19, %s323_s19 }
  0x20   :  { %362 = vmatmul.mubr.msk.f32.vlgmr.msra.gmra.mxu1 %vm60_vm2, %v58_v2  ;;  %364 = vmatprep.subr.mxu1 %v483_v0  ;;  %v55_v6 = vld [vmem:[%s572_s0] sm:$0xff]  ;;  %v229_v13 = vld [vmem:[#allocation5 + $0x40] sm:$0xff]  ;;  %v228_v14 = vld [vmem:[#allocation5 + $0x38] sm:$0xff]  ;;  %p454_p10 = scmp.ne.s32.totalorder %s323_s19, %s453_s20  ;;  %p459_p12 = scmp.lt.s32.totalorder %s453_s20, %s453_s20 }
  0x21   :  { %365 = vmatpush3.msra.mxu1 %v57_v3  ;;  %368 = vmatprep.mubr.msk.f32.mxu1 %vm484_vm0, %v483_v0  ;;  %v235_v7 = vld [vmem:[#allocation5 + $0x70] sm:$0xff]  ;;  %v226_v16 = vld [vmem:[#allocation5 + $0x28] sm:$0xff]  ;;  %v225_v17 = vld [vmem:[#allocation5 + $0x20] sm:$0xff] }
  0x22   :  { %366 = vmatprep.subr.mxu1 %v483_v0  ;;  %373 = vmatprep.subr.mxu0 %v483_v0  ;;  %v231_v11 = vld [vmem:[#allocation5 + $0x50] sm:$0xff]  ;;  %v224_v18 = vld [vmem:[#allocation5 + $0x18] sm:$0xff]  ;;  %v222_v20 = vld [vmem:[#allocation5 + $0x8] sm:$0xff]  ;;  %p460_p13 = por %p459_p12, %p458_p11 }
  0x23   :  { %367 = vmatpush3.msra.mxu1 %v56_v5  ;;  %374 = vmatpush3.msra.mxu0 %v235_v7  ;;  %v227_v15 = vld [vmem:[#allocation5 + $0x30] sm:$0xff]  ;;  %v221_v21 = vld [vmem:[#allocation5] sm:$0xff] }
  0x24   :  { %369 = vmatmul.mubr.msk.f32.vlgmr.msra.gmra.mxu1 %vm138_vm3, %v55_v6  ;;  %375 = vmatprep.subr.mxu0 %v483_v0  ;;  %v223_v19 = vld [vmem:[#allocation5 + $0x10] sm:$0xff]  ;;  %p461_p0 = pnand %p460_p13, %p454_p10 }
  0x25   :  { %376 = vmatpush3.msra.mxu0 %v234_v8  ;;  %v335_v25 = vld [vmem:[%s576_s4] ss:$0 sm:$0xff] }
  0x26   :  { %377 = vmatprep.subr.mxu0 %v483_v0  ;;  %v336_v30 = vld [vmem:[%s578_s6] ss:$0 sm:$0xff] }
  0x27   :  { %378 = vmatpush3.msra.mxu0 %v233_v9 }
  0x28   :  { %379 = vmatprep.subr.mxu0 %v483_v0 }
  0x29   :  { %380 = vmatpush3.msra.mxu0 %v232_v10 }
  0x2a   :  { %381 = vmatprep.subr.mxu0 %v483_v0 }
  0x2b   :  { %382 = vmatpush3.msra.mxu0 %v231_v11 }
  0x2c   :  { %383 = vmatprep.subr.mxu0 %v483_v0 }
  0x2d   :  { %384 = vmatpush3.msra.mxu0 %v230_v12 }
  0x2e   :  { %385 = vmatprep.subr.mxu0 %v483_v0 }
  0x2f   :  { %386 = vmatpush3.msra.mxu0 %v229_v13 }
  0x30   :  { %387 = vmatprep.subr.mxu0 %v483_v0 }
  0x31   :  { %388 = vmatpush3.msra.mxu0 %v228_v14 }
  0x32   :  { %389 = vmatprep.subr.mxu0 %v483_v0 }
  0x33   :  { %390 = vmatpush3.msra.mxu0 %v227_v15 }
  0x34   :  { %391 = vmatprep.subr.mxu0 %v483_v0 }
  0x35   :  { %392 = vmatpush3.msra.mxu0 %v226_v16 }
  0x36   :  { %393 = vmatprep.subr.mxu0 %v483_v0 }
  0x37   :  { %394 = vmatpush3.msra.mxu0 %v225_v17 }
  0x38   :  { %395 = vmatprep.subr.mxu0 %v483_v0 }
  0x39   :  { %396 = vmatpush3.msra.mxu0 %v224_v18 }
  0x3a   :  { %397 = vmatprep.subr.mxu0 %v483_v0 }
  0x3b   :  { %398 = vmatpush3.msra.mxu0 %v223_v19 }
  0x3c   :  { %399 = vmatprep.subr.mxu0 %v483_v0 }
  0x3d   :  { %400 = vmatpush3.msra.mxu0 %v222_v20 }
  0x3e   :  { %401 = vmatprep.subr.mxu0 %v483_v0 }
  0x3f   :  { %402 = vmatpush3.msra.mxu0 %v221_v21 }
  0xe0   :  { %v134_v22 = vpop.f32.mrf.mxu1 }
  0xe2   :  { %v363_v23 = vpop.f32.mrf.mxu1 }
  0xe4   :  { %v208_v24 = vpop.f32.mrf.mxu1 }
  0xe5   :  { %v209_v26 = vadd.f32 %v208_v24, %v134_v22 }
  0xe6   :  { %v370_v27 = vpop.f32.mrf.mxu1 }
  0xe7   :  { %v219_v28 = vadd.f32 %v335_v25, %v209_v26 }
  0xe9   :  { %v220_v29 = vmax.f32 %v219_v28, 0.0 }
  0xeb   :  { %404 = vmatmul.mubr.f32.vlgmr.msra.gmra.mxu0 %v220_v29 }
 0x1ab   :  { %v310_v31 = vpop.f32.mrf.mxu0 }
 0x1ac   :  { %v311_v32 = vadd.f32 %v336_v30, %v310_v31 }
 0x1ad   :  { %v405_v33 = vpop.f32.mrf.mxu0 }
 0x1ae   :  { %v314_v34 = vmax.f32 %v311_v32, 0.0 }
 0x1b0   :  { %315 = vst [vmem:[#allocation7] sm:$0xff] %v314_v34 }
 0x1b1   :  { %464 = shalt.err (!%p461_p0)
}
 0x1b2   :  { %325 = dma.vmem_to_hbm [thread:$0]  %s323_s19, 128, %s579_s7, [#allocation4]  }
 0x1b3   :  { %477 = dma.done.wait [#allocation4], 128  }
 0x1b4   :  { %478 = vsyncadd [#allocation4], 4294967168 }
 0x1b5   :  { %329 = vsyncpa [#allocation3], 1 }
 0x1b6   :  { %330 = vsyncpa [#allocation6], 1 }
 0x1b7   :  { %331 = vsyncpa [#allocation4], 1 }

</bundles_post_ra>
